<compile_context>
chip_gen: v6e
topology: v6e:2x2x1
jax: 0.10.0
libtpu: 0.0.40
codegen_flags: <defaults>
</compile_context>

<pallas_src>
import jax
import jax.numpy as jnp
from jax.experimental import pallas as pl
from jax.experimental.pallas import tpu as pltpu

LANE = 128
VMEM_LIMIT = 48 * 1024 * 1024   # safe on v7x (64 MiB physical), raises v5e/v6e scoped default


def _round_up(x, m):
    return (x + m - 1) // m * m


# -------- Pass 1: tiled conv matmul (K reduction) + bf16 conv output + BN partial stats -----
def conv_stats_kernel(p_ref, w_ref, conv_ref, sum_ref, sq_ref, acc_ref):
    k = pl.program_id(1)

    @pl.when(k == 0)
    def _():
        acc_ref[...] = jnp.zeros_like(acc_ref)

    acc_ref[...] += jnp.dot(p_ref[...], w_ref[...], preferred_element_type=jnp.float32)

    @pl.when(k == pl.num_programs(1) - 1)
    def _():
        y = acc_ref[...]
        conv_ref[...] = y.astype(conv_ref.dtype)          # bf16 conv tile consumed by pass 2
        # VPU partial reduce: sublane-aligned (TILE_R//8, 8, C) slabs added together
        # (pure VALU); the final 8-row reduce is done in the XLA glue.
        c = y.shape[-1]
        sum_ref[...] = jnp.sum(y.reshape(-1, 8, c), axis=0, keepdims=True)
        sq_ref[...] = jnp.sum((y * y).reshape(-1, 8, c), axis=0, keepdims=True)


# -------- Pass 2: pure elementwise BatchNorm affine + ReLU over the stored conv tiles -------
def bn_relu_kernel(y_ref, scale_ref, shift_ref, o_ref):
    y = y_ref[...].astype(jnp.float32)
    o_ref[...] = jnp.maximum(y * scale_ref[...] + shift_ref[...], 0.0)


def gcnn_forward(x, weight, bias, gamma, beta, *, eps=1e-5):
    """x: (N, C_in, H, W) f32 NCHW; weight: (C_out, C_in, 4, 4); bias/gamma/beta: (C_out,)."""
    del bias  # exactly cancelled by training-mode BatchNorm mean subtraction
    N, C_in, H, W = x.shape
    C_out = weight.shape[0]
    kh = kw = 4
    stride = 2
    pad = 1
    Ho = (H + 2 * pad - kh) // stride + 1   # matches PyTorch floor formula (odd H/W safe)
    Wo = (W + 2 * pad - kw) // stride + 1

    # --- XLA glue: reflect pad + im2col in bf16; column order (c, kh, kw) == weight flatten ---
    xb = x.astype(jnp.bfloat16)
    xp = jnp.pad(xb, ((0, 0), (0, 0), (pad, pad), (pad, pad)), mode="reflect")
    cols = []
    for i in range(kh):
        for j in range(kw):
            cols.append(xp[:, :, i:i + stride * Ho:stride, j:j + stride * Wo:stride])
    patches = jnp.stack(cols, axis=0).reshape(kh, kw, N, C_in, Ho, Wo)
    patches = jnp.transpose(patches, (2, 4, 5, 3, 0, 1)).reshape(N * Ho * Wo, C_in * kh * kw)

    R, K = patches.shape
    C_pad = _round_up(C_out, LANE)          # lane-dense output channels

    # K tiling: keep the full contraction resident when small, otherwise tile it
    # (trailing "arbitrary" reduction axis with an f32 VMEM accumulator).
    K_al = _round_up(K, LANE)
    TILE_K = K_al if K_al <= 2048 else 2048
    K_pad = _round_up(K, TILE_K)

    # R tiling: keep the double-buffered working set <= ~40 MiB (fits v7x's 64 MiB VMEM),
    # and prefer >= 2 R tiles so both v7x TensorCores get work along the "parallel" axis.
    def footprint(tr):
        return (2 * tr * TILE_K * 2          # patch tiles (bf16, double buffered)
                + 2 * TILE_K * C_pad * 2     # weight tiles (bf16, double buffered)
                + 2 * tr * C_pad * 2         # conv-out tiles (bf16, double buffered)
                + tr * C_pad * 4             # f32 accumulator scratch
                + 2 * tr * C_pad * 4)        # pass-2 f32 output tiles

    tile_r_cap = 1024
    while tile_r_cap > 64 and footprint(tile_r_cap) > 40 * 1024 * 1024:
        tile_r_cap //= 2
    R_al = _round_up(R, 8)
    TILE_R = min(tile_r_cap, _round_up(max(R_al // 2, 8), 8)) if R_al > 8 else 8
    R_pad = _round_up(R, TILE_R)
    num_r = R_pad // TILE_R
    num_k = K_pad // TILE_K

    # Lane-dense, zero-padded bf16 MXU operands (padded rows/cols contribute exactly zero).
    patches_p = jnp.zeros((R_pad, K_pad), jnp.bfloat16).at[:R, :K].set(patches)
    w2d = weight.reshape(C_out, K).T        # (K, C_out)
    w_p = jnp.zeros((K_pad, C_pad), jnp.bfloat16).at[:K, :C_out].set(w2d.astype(jnp.bfloat16))

    p_spec = pl.BlockSpec((TILE_R, TILE_K), lambda i, k: (i, k))
    # NOTE: when num_k == 1 the weight block index is constant, so it is DMA'd only once
    # and stays resident (the 2-buffer reservation is accounted for in the budget above).
    w_spec = pl.BlockSpec((TILE_K, C_pad), lambda i, k: (k, 0))
    conv_spec = pl.BlockSpec((TILE_R, C_pad), lambda i, k: (i, 0))
    stat_spec = pl.BlockSpec((1, 8, C_pad), lambda i, k: (i, 0, 0))

    # ---- pass 1: conv matmul (K-tiled reduction) + bf16 conv output + BN partial stats ----
    conv_out, sums, sqs = pl.pallas_call(
        conv_stats_kernel,
        out_shape=(jax.ShapeDtypeStruct((R_pad, C_pad), jnp.bfloat16),
                   jax.ShapeDtypeStruct((num_r, 8, C_pad), jnp.float32),
                   jax.ShapeDtypeStruct((num_r, 8, C_pad), jnp.float32)),
        grid=(num_r, num_k),
        in_specs=[p_spec, w_spec],
        out_specs=(conv_spec, stat_spec, stat_spec),
        scratch_shapes=[pltpu.VMEM((TILE_R, C_pad), jnp.float32)],
        compiler_params=pltpu.CompilerParams(
            dimension_semantics=("parallel", "arbitrary"),
            vmem_limit_bytes=VMEM_LIMIT),
    )(patches_p, w_p)

    # ---- tiny per-channel reduction + BN fold (XLA glue) ----
    total_sum = jnp.sum(sums, axis=(0, 1))                 # (C_pad,)
    total_sq = jnp.sum(sqs, axis=(0, 1))
    mean = total_sum / R                                   # true (unpadded) row count
    # TODO(synk): E[y^2]-E[y]^2 in f32 can cancel for |mean| >> std; a shifted/Welford
    #             combine would be more robust.  Clamp keeps it non-negative.
    var = jnp.maximum(total_sq / R - mean * mean, 0.0)     # biased variance (training-mode BN)
    gamma_p = jnp.zeros((C_pad,), jnp.float32).at[:C_out].set(gamma.astype(jnp.float32))
    beta_p = jnp.zeros((C_pad,), jnp.float32).at[:C_out].set(beta.astype(jnp.float32))
    scale = gamma_p * jax.lax.rsqrt(var + eps)
    shift = beta_p - mean * scale
    scale2d = scale.reshape(1, C_pad)
    shift2d = shift.reshape(1, C_pad)

    # ---- pass 2: elementwise BN affine + ReLU over the stored bf16 conv tiles ----
    y_spec = pl.BlockSpec((TILE_R, C_pad), lambda i: (i, 0))
    vec_spec = pl.BlockSpec((1, C_pad), lambda i: (0, 0))
    out = pl.pallas_call(
        bn_relu_kernel,
        out_shape=jax.ShapeDtypeStruct((R_pad, C_pad), jnp.float32),
        grid=(num_r,),
        in_specs=[y_spec, vec_spec, vec_spec],
        out_specs=y_spec,
        compiler_params=pltpu.CompilerParams(
            dimension_semantics=("parallel",),
            vmem_limit_bytes=VMEM_LIMIT),
    )(conv_out, scale2d, shift2d)

    # rows ordered (n, ho, wo), channel last -> slice off padding, return NCHW (module contract)
    # TODO(synk): in a stacked encoder, return NHWC and fold this transpose into the next im2col.
    out = out[:R, :C_out].reshape(N, Ho, Wo, C_out)
    return jnp.transpose(out, (0, 3, 1, 2))


if __name__ == "__main__":
    key = jax.random.PRNGKey(0)
    kx, kw_, kb, kg, kbe = jax.random.split(key, 5)

    N, C_in, C_out, H, W = 2, 4, 8, 16, 16
    x = jax.random.normal(kx, (N, C_in, H, W), dtype=jnp.float32)
    weight = 0.1 * jax.random.normal(kw_, (C_out, C_in, 4, 4), dtype=jnp.float32)
    bias = 0.1 * jax.random.normal(kb, (C_out,), dtype=jnp.float32)
    gamma = 1.0 + 0.1 * jax.random.normal(kg, (C_out,), dtype=jnp.float32)
    beta = 0.1 * jax.random.normal(kbe, (C_out,), dtype=jnp.float32)

    fwd = jax.jit(gcnn_forward)
    y = fwd(x, weight, bias, gamma, beta)
    jax.block_until_ready(y)
    assert y.shape == (N, C_out, H // 2, W // 2)
    assert bool(jnp.all(jnp.isfinite(y)))
    print("KERNEL_OK")
</pallas_src>

<mosaic_0001>
module attributes {stable_mosaic.version = 11 : i64} {
  func.func @conv_stats_kernel(%arg0: i32, %arg1: i32, %arg2: memref<64x128xbf16, #tpu.memory_space<vmem>>, %arg3: memref<128x128xbf16, #tpu.memory_space<vmem>>, %arg4: memref<64x128xbf16, #tpu.memory_space<vmem>>, %arg5: memref<1x8x128xf32, #tpu.memory_space<vmem>>, %arg6: memref<1x8x128xf32, #tpu.memory_space<vmem>>, %arg7: memref<64x128xf32, #tpu.memory_space<vmem>>) attributes {dimension_semantics = [#tpu.dimension_semantics<parallel>, #tpu.dimension_semantics<arbitrary>], iteration_bounds = array<i64: 2, 1>, scalar_prefetch = 0 : i64, scratch_operands = 1 : i64, tpu.core_type = #tpu.core_type<tc>, window_params = [{transform_indices = @transform_0, window_bounds = array<i64: 64, 128>}, {transform_indices = @transform_1, window_bounds = array<i64: 128, 128>}, {transform_indices = @transform_2, window_bounds = array<i64: 64, 128>}, {transform_indices = @transform_3, window_bounds = array<i64: 1, 8, 128>}, {transform_indices = @transform_4, window_bounds = array<i64: 1, 8, 128>}]} {
    %c0_i32 = arith.constant 0 : i32
    %0 = arith.cmpi eq, %arg1, %c0_i32 : i32
    %1 = arith.extui %0 : i1 to i32
    %c0_i32_0 = arith.constant 0 : i32
    %2 = arith.cmpi ne, %1, %c0_i32_0 : i32
    scf.if %2 {
      %cst_10 = arith.constant 0.000000e+00 : f32
      %12 = vector.broadcast %cst_10 : f32 to vector<64x128xf32>
      %c0_11 = arith.constant 0 : index
      %c0_12 = arith.constant 0 : index
      %13 = vector.load %arg7[%c0_11, %c0_12] : memref<64x128xf32, #tpu.memory_space<vmem>>, vector<64x128xf32>
      tpu.vector_store %arg7[%c0_11, %c0_12], %12 {strides = array<i32>} : memref<64x128xf32, #tpu.memory_space<vmem>>, vector<64x128xf32>,
    } else {
    }
    %c0 = arith.constant 0 : index
    %c0_1 = arith.constant 0 : index
    %3 = vector.load %arg7[%c0, %c0_1] : memref<64x128xf32, #tpu.memory_space<vmem>>, vector<64x128xf32>
    %c0_2 = arith.constant 0 : index
    %c0_3 = arith.constant 0 : index
    %4 = vector.load %arg2[%c0_2, %c0_3] : memref<64x128xbf16, #tpu.memory_space<vmem>>, vector<64x128xbf16>
    %c0_4 = arith.constant 0 : index
    %c0_5 = arith.constant 0 : index
    %5 = vector.load %arg3[%c0_4, %c0_5] : memref<128x128xbf16, #tpu.memory_space<vmem>>, vector<128x128xbf16>
    %cst = arith.constant dense<0.000000e+00> : vector<64x128xf32>
    %6 = tpu.matmul %4, %5, %cst {dimension_numbers = #tpu.dot_dimension_numbers<[1], [0], [0], [1], [0, 0, 1, 1], [], []>} : vector<64x128xbf16>, vector<128x128xbf16>, vector<64x128xf32> -> vector<64x128xf32>
    %7 = arith.addf %3, %6 : vector<64x128xf32>
    %c0_6 = arith.constant 0 : index
    %c0_7 = arith.constant 0 : index
    %8 = vector.load %arg7[%c0_6, %c0_7] : memref<64x128xf32, #tpu.memory_space<vmem>>, vector<64x128xf32>
    tpu.vector_store %arg7[%c0_6, %c0_7], %7 {strides = array<i32>} : memref<64x128xf32, #tpu.memory_space<vmem>>, vector<64x128xf32>,
    %c0_i32_8 = arith.constant 0 : i32
    %9 = arith.cmpi eq, %arg1, %c0_i32_8 : i32
    %10 = arith.extui %9 : i1 to i32
    %c0_i32_9 = arith.constant 0 : i32
    %11 = arith.cmpi ne, %10, %c0_i32_9 : i32
    scf.if %11 {
      %c0_10 = arith.constant 0 : index
      %c0_11 = arith.constant 0 : index
      %12 = vector.load %arg7[%c0_10, %c0_11] : memref<64x128xf32, #tpu.memory_space<vmem>>, vector<64x128xf32>
      %13 = arith.truncf %12 : vector<64x128xf32> to vector<64x128xbf16>
      %c0_12 = arith.constant 0 : index
      %c0_13 = arith.constant 0 : index
      %14 = vector.load %arg4[%c0_12, %c0_13] : memref<64x128xbf16, #tpu.memory_space<vmem>>, vector<64x128xbf16>
      tpu.vector_store %arg4[%c0_12, %c0_13], %13 {strides = array<i32>} : memref<64x128xbf16, #tpu.memory_space<vmem>>, vector<64x128xbf16>,
      %15 = vector.shape_cast %12 : vector<64x128xf32> to vector<8x8x128xf32>
      %cst_14 = arith.constant dense<0.000000e+00> : vector<8x128xf32>
      %16 = vector.multi_reduction <add>, %15, %cst_14 [0] : vector<8x8x128xf32> to vector<8x128xf32>
      %17 = vector.shape_cast %16 : vector<8x128xf32> to vector<1x8x128xf32>
      %c0_15 = arith.constant 0 : index
      %c0_16 = arith.constant 0 : index
      %c0_17 = arith.constant 0 : index
      %18 = vector.load %arg5[%c0_15, %c0_16, %c0_17] : memref<1x8x128xf32, #tpu.memory_space<vmem>>, vector<1x8x128xf32>
      tpu.vector_store %arg5[%c0_15, %c0_16, %c0_17], %17 {strides = array<i32>} : memref<1x8x128xf32, #tpu.memory_space<vmem>>, vector<1x8x128xf32>,
      %19 = arith.mulf %12, %12 : vector<64x128xf32>
      %20 = vector.shape_cast %19 : vector<64x128xf32> to vector<8x8x128xf32>
      %cst_18 = arith.constant dense<0.000000e+00> : vector<8x128xf32>
      %21 = vector.multi_reduction <add>, %20, %cst_18 [0] : vector<8x8x128xf32> to vector<8x128xf32>
      %22 = vector.shape_cast %21 : vector<8x128xf32> to vector<1x8x128xf32>
      %c0_19 = arith.constant 0 : index
      %c0_20 = arith.constant 0 : index
      %c0_21 = arith.constant 0 : index
      %23 = vector.load %arg6[%c0_19, %c0_20, %c0_21] : memref<1x8x128xf32, #tpu.memory_space<vmem>>, vector<1x8x128xf32>
      tpu.vector_store %arg6[%c0_19, %c0_20, %c0_21], %22 {strides = array<i32>} : memref<1x8x128xf32, #tpu.memory_space<vmem>>, vector<1x8x128xf32>,
    } else {
    }
    return
  }
  func.func @transform_0(%arg0: i32, %arg1: i32) -> (i32, i32) {
    %c0_i32 = arith.constant 0 : i32
    return %arg0, %arg1 : i32, i32
  }
  func.func @transform_1(%arg0: i32, %arg1: i32) -> (i32, i32) {
    %c0_i32 = arith.constant 0 : i32
    %c0_i32_0 = arith.constant 0 : i32
    return %arg1, %c0_i32 : i32, i32
  }
  func.func @transform_2(%arg0: i32, %arg1: i32) -> (i32, i32) {
    %c0_i32 = arith.constant 0 : i32
    %c0_i32_0 = arith.constant 0 : i32
    return %arg0, %c0_i32 : i32, i32
  }
  func.func @transform_3(%arg0: i32, %arg1: i32) -> (i32, i32, i32) {
    %c0_i32 = arith.constant 0 : i32
    %c0_i32_0 = arith.constant 0 : i32
    %c0_i32_1 = arith.constant 0 : i32
    return %arg0, %c0_i32, %c0_i32_0 : i32, i32, i32
  }
  func.func @transform_4(%arg0: i32, %arg1: i32) -> (i32, i32, i32) {
    %c0_i32 = arith.constant 0 : i32
    %c0_i32_0 = arith.constant 0 : i32
    %c0_i32_1 = arith.constant 0 : i32
    return %arg0, %c0_i32, %c0_i32_0 : i32, i32, i32
  }
}

module attributes {stable_mosaic.version = 11 : i64} {
  func.func @bn_relu_kernel(%arg0: i32, %arg1: memref<64x128xbf16, #tpu.memory_space<vmem>>, %arg2: memref<1x128xf32, #tpu.memory_space<vmem>>, %arg3: memref<1x128xf32, #tpu.memory_space<vmem>>, %arg4: memref<64x128xf32, #tpu.memory_space<vmem>>) attributes {dimension_semantics = [#tpu.dimension_semantics<parallel>], iteration_bounds = array<i64: 2>, scalar_prefetch = 0 : i64, scratch_operands = 0 : i64, tpu.core_type = #tpu.core_type<tc>, window_params = [{transform_indices = @transform_0, window_bounds = array<i64: 64, 128>}, {pipeline_mode = #tpu.pipeline_mode<synchronous>, transform_indices = @transform_1, window_bounds = array<i64: 1, 128>}, {pipeline_mode = #tpu.pipeline_mode<synchronous>, transform_indices = @transform_2, window_bounds = array<i64: 1, 128>}, {transform_indices = @transform_3, window_bounds = array<i64: 64, 128>}]} {
    %c0 = arith.constant 0 : index
    %c0_0 = arith.constant 0 : index
    %0 = vector.load %arg1[%c0, %c0_0] : memref<64x128xbf16, #tpu.memory_space<vmem>>, vector<64x128xbf16>
    %1 = arith.extf %0 : vector<64x128xbf16> to vector<64x128xf32>
    %c0_1 = arith.constant 0 : index
    %c0_2 = arith.constant 0 : index
    %2 = vector.load %arg2[%c0_1, %c0_2] : memref<1x128xf32, #tpu.memory_space<vmem>>, vector<1x128xf32>
    %3 = vector.broadcast %2 : vector<1x128xf32> to vector<64x128xf32>
    %4 = arith.mulf %1, %3 : vector<64x128xf32>
    %c0_3 = arith.constant 0 : index
    %c0_4 = arith.constant 0 : index
    %5 = vector.load %arg3[%c0_3, %c0_4] : memref<1x128xf32, #tpu.memory_space<vmem>>, vector<1x128xf32>
    %6 = vector.broadcast %5 : vector<1x128xf32> to vector<64x128xf32>
    %7 = arith.addf %4, %6 : vector<64x128xf32>
    %cst = arith.constant 0.000000e+00 : f32
    %8 = vector.broadcast %cst : f32 to vector<64x128xf32>
    %9 = arith.maximumf %7, %8 : vector<64x128xf32>
    %c0_5 = arith.constant 0 : index
    %c0_6 = arith.constant 0 : index
    %10 = vector.load %arg4[%c0_5, %c0_6] : memref<64x128xf32, #tpu.memory_space<vmem>>, vector<64x128xf32>
    tpu.vector_store %arg4[%c0_5, %c0_6], %9 {strides = array<i32>} : memref<64x128xf32, #tpu.memory_space<vmem>>, vector<64x128xf32>,
    return
  }
  func.func @transform_0(%arg0: i32) -> (i32, i32) {
    %c0_i32 = arith.constant 0 : i32
    %c0_i32_0 = arith.constant 0 : i32
    return %arg0, %c0_i32 : i32, i32
  }
  func.func @transform_1(%arg0: i32) -> (i32, i32) {
    %c0_i32 = arith.constant 0 : i32
    %c0_i32_0 = arith.constant 0 : i32
    %c0_i32_1 = arith.constant 0 : i32
    return %c0_i32, %c0_i32_0 : i32, i32
  }
  func.func @transform_2(%arg0: i32) -> (i32, i32) {
    %c0_i32 = arith.constant 0 : i32
    %c0_i32_0 = arith.constant 0 : i32
    %c0_i32_1 = arith.constant 0 : i32
    return %c0_i32, %c0_i32_0 : i32, i32
  }
  func.func @transform_3(%arg0: i32) -> (i32, i32) {
    %c0_i32 = arith.constant 0 : i32
    %c0_i32_0 = arith.constant 0 : i32
    return %arg0, %c0_i32 : i32, i32
  }
}

</mosaic_0001>

<bundles_post_ra>
// kernel: gcnn_forward.3
= control target key start
LH: loop header
LB: loop body
LE: loop exit
PB: predicated region body
PF: predicated region fallthrough
CT: control target
= control target key end

     0   :  { %s360_s12 = smov 0   ;;  %s387_s0 = inlined_call_operand.vmem [shape: bf16[128,128], index: 0, kind: input, shape index: {}]   ;;  %s388_s1 = inlined_call_operand.vmem [shape: f32[1,128], index: 1, kind: input, shape index: {}]   ;;  %s389_s2 = inlined_call_operand.vmem [shape: f32[1,128], index: 2, kind: input, shape index: {}]   ;;  %s390_s3 = inlined_call_operand.vmem [shape: f32[128,128], index: 3, kind: output, shape index: {}]  }
   0x1 LB: > { %s292_s13 = sadd.s32 4294967295, %s338_s12   ;;  %p296_p0 = scmp.ge.s32.totalorder %s338_s12, 1  ;;  %s338_s12 = sphi %s360_s12, %s13_s12  }
   0x2   : > { %p138_p1 = scmp.lt.s32.totalorder %s338_s12, 3 }
   0x4   : > { %p139_p2 = pnand %p296_p0, %p138_p1 }
   0x5   : > { %s297_s14 = sshll.u32 (!%p139_p2), %s292_s13, 3 }
   0x6   : > { %142 = sbr.rel (%p139_p2) target bundleno = 27 (0x1b), region = 32  ;;  %p163_p3 = scmp.lt.s32.totalorder (!%p139_p2), %s297_s14, 15 }
   0xb   : > { %s392_s14 = smov (!%p163_p3, %s297_s14), 15  ;;  %v301_v0 = vld [vmem:[%s388_s1] ss:$0 sm:$0xff] }
   0xc   : > { %s298_s15 = sshll.u32 %s392_s14, 2  ;;  %v302_v9 = vld [vmem:[%s389_s2] ss:$0 sm:$0xff]  ;;  %s300_s23 = sshll.u32 %s392_s14, 3 }
   0xd   : > { %s166_s18 = scalar_lea.vmem %s387_s0, %s298_s15  ;;  %s172_s26 = scalar_lea.vmem %s390_s3, %s300_s23 }
   0xe   : > { %v306_v1 = vld [vmem:[%s166_s18] sm:$0xff]   ;;  %v321_v2 = vld [vmem:[%s166_s18 + $0x8] sm:$0xff]   ;;  %v322_v3 = vld [vmem:[%s166_s18 + $0x10] sm:$0xff]  }
   0xf   : > { %v307_v4 = vunpack.c.l.bf16 %v306_v1  ;;  %v308_v5 = vunpack.c.h.bf16 %v306_v1  ;;  %v311_v6 = vunpack.c.l.bf16 %v321_v2  ;;  %v312_v7 = vunpack.c.h.bf16 %v321_v2  ;;  %v323_v8 = vld [vmem:[%s166_s18 + $0x18] sm:$0xff]  }
  0x10   : > { %v315_v10 = vunpack.c.l.bf16 %v322_v3  ;;  %v316_v11 = vunpack.c.h.bf16 %v322_v3  ;;  %v319_v12 = vunpack.c.l.bf16 %v323_v8  ;;  %v320_v13 = vunpack.c.h.bf16 %v323_v8 }
  0x11   : > { %v197_v14 = vmul.f32 %v307_v4, %v301_v0  ;;  %v198_v15 = vmul.f32 %v308_v5, %v301_v0  ;;  %v199_v16 = vmul.f32 %v311_v6, %v301_v0  ;;  %v200_v17 = vmul.f32 %v312_v7, %v301_v0 }
  0x12   : > { %v201_v18 = vmul.f32 %v315_v10, %v301_v0  ;;  %v202_v19 = vmul.f32 %v316_v11, %v301_v0  ;;  %v203_v20 = vmul.f32 %v319_v12, %v301_v0  ;;  %v204_v21 = vmul.f32 %v320_v13, %v301_v0 }
  0x13   : > { %v212_v22 = vadd.f32 %v302_v9, %v197_v14  ;;  %v213_v23 = vadd.f32 %v302_v9, %v198_v15  ;;  %v214_v24 = vadd.f32 %v302_v9, %v199_v16  ;;  %v215_v25 = vadd.f32 %v302_v9, %v200_v17 }
  0x14   : > { %v216_v26 = vadd.f32 %v302_v9, %v201_v18  ;;  %v217_v27 = vadd.f32 %v302_v9, %v202_v19  ;;  %v218_v28 = vadd.f32 %v302_v9, %v203_v20  ;;  %v219_v29 = vadd.f32 %v302_v9, %v204_v21 }
  0x15   : > { %v220_v30 = vmax.f32 %v212_v22, 0.0  ;;  %v221_v31 = vmax.f32 %v213_v23, 0.0  ;;  %v222_v32 = vmax.f32 %v214_v24, 0.0  ;;  %v223_v33 = vmax.f32 %v215_v25, 0.0 }
  0x16   : > { %v224_v34 = vmax.f32 %v216_v26, 0.0  ;;  %v225_v35 = vmax.f32 %v217_v27, 0.0  ;;  %v226_v36 = vmax.f32 %v218_v28, 0.0  ;;  %v227_v37 = vmax.f32 %v219_v29, 0.0 }
  0x17   : > { %228 = vst [vmem:[%s172_s26] sm:$0xff] %v220_v30  ;;  %229 = vst [vmem:[%s172_s26 + $0x8] sm:$0xff] %v221_v31 }
  0x18   : > { %230 = vst [vmem:[%s172_s26 + $0x10] sm:$0xff] %v222_v32  ;;  %231 = vst [vmem:[%s172_s26 + $0x18] sm:$0xff] %v223_v33 }
  0x19   : > { %232 = vst [vmem:[%s172_s26 + $0x20] sm:$0xff] %v224_v34  ;;  %233 = vst [vmem:[%s172_s26 + $0x28] sm:$0xff] %v225_v35 }
  0x1a   : > { %234 = vst [vmem:[%s172_s26 + $0x30] sm:$0xff] %v226_v36  ;;  %235 = vst [vmem:[%s172_s26 + $0x38] sm:$0xff] %v227_v37 }
  0x1b PF: > { %s13_s12 = sadd.s32 1, %s338_s12  }
  0x1c   : > { %p10_p4 = scmp.ge.s32.totalorder %s13_s12, 4  }
  0x1e   :  { %12 = sbr.rel (!%p10_p4) target bundleno = 1 (0x1), region = 62 }

// kernel: gcnn_forward.2
= control target key start
LH: loop header
LB: loop body
LE: loop exit
PB: predicated region body
PF: predicated region fallthrough
CT: control target
= control target key end

     0   :  { %s887_s15 = smov 0   ;;  %s889_s16 = smov 0   ;;  %s968_s0 = inlined_call_operand.vmem [shape: bf16[128,128], index: 0, kind: input, shape index: {}]   ;;  %s969_s1 = inlined_call_operand.vmem [shape: bf16[128,128], index: 1, kind: input, shape index: {}]   ;;  %s970_s2 = inlined_call_operand.vmem [shape: bf16[128,128], index: 2, kind: output, shape index: {0}]   ;;  %s971_s3 = inlined_call_operand.vmem [shape: f32[2,8,128], index: 3, kind: output, shape index: {1}]   ;;  %s972_s4 = inlined_call_operand.vmem [shape: f32[2,8,128], index: 4, kind: output, shape index: {2}]  }
   0x1   :  { %s891_s17 = smov 0  }
   0x2 LB: > { %s27_s18 = sadd.s32 1, %s856_s16  ;;  %p690_p0 = scmp.ge.s32.totalorder %s860_s17, 1  ;;  %s860_s17 = sphi %s891_s17, %s15_s17   ;;  %s856_s16 = sphi %s889_s16, %s974_s16   ;;  %s852_s15 = sphi %s887_s15, %s973_s15  }
   0x3   : > { %p29_p1 = scmp.ge.s32.totalorder %s27_s18, 2  ;;  %p196_p2 = scmp.lt.s32.totalorder %s860_s17, 3 }
   0x5   : > { %s976_s18 = smov (%p29_p1, %s27_s18), 0  ;;  %p197_p3 = pnand %p690_p0, %p196_p2 }
   0x6   : > { %s691_s21 = sshll.u32 (!%p197_p3), %s852_s15, 3  ;;  %p259_p5 = scmp.lt.s32.totalorder (!%p197_p3), %s852_s15, 1 }
   0x7   : > { %200 = sbr.rel (%p197_p3) target bundleno = 261 (0x105), region = 28  ;;  %p239_p4 = scmp.lt.s32.totalorder (!%p197_p3), %s691_s21, 15 }
   0xc   : > { %v826_v0 = vld [vmem:[%s969_s1 + $0x38] sm:$0xff]   ;;  %v827_v1 = vld [vmem:[%s969_s1 + $0x30] sm:$0xff]   ;;  %s978_s21 = smov (!%p239_p4, %s691_s21), 15  ;;  %v828_v2 = vld [vmem:[%s969_s1 + $0x28] sm:$0xff]   ;;  %s980_s15 = smov (!%p259_p5, %s852_s15), 1 }
   0xd   : > { %762 = vmatprep.subr.bf16.mxu0 %v826_v0  ;;  %786 = vmatprep.subr.bf16.mxu1 %v826_v0  ;;  %s692_s26 = sshll.u32 %s978_s21, 2  ;;  %v829_v3 = vld [vmem:[%s969_s1 + $0x20] sm:$0xff]   ;;  %v830_v6 = vld [vmem:[%s969_s1 + $0x18] sm:$0xff]   ;;  %v831_v7 = vld [vmem:[%s969_s1 + $0x10] sm:$0xff]   ;;  %s695_s21 = sshll.u32 %s980_s15, 3 }
   0xe   : > { %763 = vmatpush3.bf16.msra.mxu0 %v826_v0  ;;  %794 = vmatpush3.bf16.msra.mxu1 %v826_v0  ;;  %s925_s29 = scalar_lea.vmem %s968_s0, %s692_s26  ;;  %v832_v8 = vld [vmem:[%s969_s1 + $0x8] sm:$0xff]   ;;  %v833_v9 = vld [vmem:[%s969_s1] sm:$0xff]   ;;  %s257_s20 = scalar_lea.vmem %s970_s2, %s692_s26 }
   0xf   : > { %764 = vmatprep.subr.bf16.mxu0 %v827_v1  ;;  %787 = vmatprep.subr.bf16.mxu1 %v827_v1  ;;  %v834_v4 = vld [vmem:[%s925_s29] sm:$0xff]   ;;  %v836_v5 = vld [vmem:[%s925_s29 + $0x10] sm:$0xff]   ;;  %v835_v10 = vld [vmem:[%s925_s29 + $0x8] sm:$0xff]   ;;  %s262_s24 = scalar_lea.vmem %s971_s3, %s695_s21  ;;  %s266_s27 = scalar_lea.vmem %s972_s4, %s695_s21 }
  0x10   : > { %778 = vmatprep.mubr.bf16.mxu0 %v834_v4  ;;  %782 = vmatprep.mubr.bf16.mxu1 %v836_v5  ;;  %v837_v11 = vld [vmem:[%s925_s29 + $0x18] sm:$0xff]  }
  0x12   : > { %765 = vmatpush3.bf16.msra.mxu0 %v827_v1  ;;  %795 = vmatpush3.bf16.msra.mxu1 %v827_v1 }
  0x13   : > { %766 = vmatprep.subr.bf16.mxu0 %v828_v2  ;;  %788 = vmatprep.subr.bf16.mxu1 %v828_v2 }
  0x16   : > { %767 = vmatpush3.bf16.msra.mxu0 %v828_v2  ;;  %796 = vmatpush3.bf16.msra.mxu1 %v828_v2 }
  0x17   : > { %768 = vmatprep.subr.bf16.mxu0 %v829_v3  ;;  %789 = vmatprep.subr.bf16.mxu1 %v829_v3 }
  0x1a   : > { %769 = vmatpush3.bf16.msra.mxu0 %v829_v3  ;;  %797 = vmatpush3.bf16.msra.mxu1 %v829_v3 }
  0x1b   : > { %770 = vmatprep.subr.bf16.mxu0 %v830_v6  ;;  %790 = vmatprep.subr.bf16.mxu1 %v830_v6 }
  0x1e   : > { %771 = vmatpush3.bf16.msra.mxu0 %v830_v6  ;;  %798 = vmatpush3.bf16.msra.mxu1 %v830_v6 }
  0x1f   : > { %772 = vmatprep.subr.bf16.mxu0 %v831_v7  ;;  %791 = vmatprep.subr.bf16.mxu1 %v831_v7 }
  0x22   : > { %773 = vmatpush3.bf16.msra.mxu0 %v831_v7  ;;  %799 = vmatpush3.bf16.msra.mxu1 %v831_v7 }
  0x23   : > { %774 = vmatprep.subr.bf16.mxu0 %v832_v8  ;;  %792 = vmatprep.subr.bf16.mxu1 %v832_v8 }
  0x26   : > { %775 = vmatpush3.bf16.msra.mxu0 %v832_v8  ;;  %800 = vmatpush3.bf16.msra.mxu1 %v832_v8 }
  0x27   : > { %776 = vmatprep.subr.bf16.mxu0 %v833_v9  ;;  %793 = vmatprep.subr.bf16.mxu1 %v833_v9 }
  0x2a   : > { %777 = vmatpush3.bf16.msra.mxu0 %v833_v9  ;;  %801 = vmatpush3.bf16.msra.mxu1 %v833_v9 }
  0x2d   : > { %779 = vmatmul.mubr.bf16.vlgmr.msra.gmra.mxu0 %v835_v10  ;;  %783 = vmatmul.mubr.bf16.vlgmr.msra.gmra.mxu1 %v837_v11 }
  0xed   : > { %v780_v12 = vpop.f32.mrf.mxu0  ;;  %v784_v13 = vpop.f32.mrf.mxu1 }
  0xee   : > { %v526_v27 = vmul.f32 %v780_v12, %v780_v12  ;;  %v530_v39 = vmul.f32 %v784_v13, %v784_v13 }
  0xef   : > { %v418_v14 = vpop.f32.mrf.mxu0  ;;  %v434_v15 = vpop.f32.mrf.mxu1 }
  0xf0   : > { %v524_v20 = vmul.f32 %v418_v14, %v418_v14  ;;  %v528_v33 = vmul.f32 %v434_v15, %v434_v15 }
  0xf1   : > { %v781_v16 = vpop.f32.mrf.mxu0  ;;  %v785_v17 = vpop.f32.mrf.mxu1 }
  0xf2   : > { %v735_v18 = vpack.c.bf16 %v781_v16, %v780_v12  ;;  %v745_v19 = vpack.c.bf16 %v785_v17, %v784_v13  ;;  %v527_v30 = vmul.f32 %v781_v16, %v781_v16  ;;  %v531_v42 = vmul.f32 %v785_v17, %v785_v17 }
  0xf3   : > { %v421_v21 = vpop.f32.mrf.mxu0  ;;  %v437_v22 = vpop.f32.mrf.mxu1 }
  0xf4   : > { %747 = vst [vmem:[%s257_s20 + $0x8] sm:$0xff] %v735_v18   ;;  %v730_v23 = vpack.c.bf16 %v421_v21, %v418_v14  ;;  %v516_v24 = vadd.f32 %v421_v21, %v418_v14  ;;  %v525_v25 = vmul.f32 %v421_v21, %v421_v21  ;;  %749 = vst [vmem:[%s257_s20 + $0x18] sm:$0xff] %v745_v19  }
  0xf5   : > { %v740_v26 = vpack.c.bf16 %v437_v22, %v434_v15  ;;  %v529_v37 = vmul.f32 %v437_v22, %v437_v22 }
  0xf6   : > { %731 = vst [vmem:[%s257_s20] sm:$0xff] %v730_v23   ;;  %v517_v28 = vadd.f32 %v780_v12, %v516_v24  ;;  %v532_v29 = vadd.f32 %v525_v25, %v524_v20 }
  0xf7   : > { %748 = vst [vmem:[%s257_s20 + $0x10] sm:$0xff] %v740_v26  }
  0xf8   : > { %v533_v31 = vadd.f32 %v532_v29, %v526_v27  ;;  %v518_v32 = vadd.f32 %v781_v16, %v517_v28 }
  0xfa   : > { %v519_v34 = vadd.f32 %v518_v32, %v434_v15  ;;  %v534_v35 = vadd.f32 %v533_v31, %v527_v30 }
  0xfc   : > { %v520_v36 = vadd.f32 %v519_v34, %v437_v22  ;;  %v535_v38 = vadd.f32 %v534_v35, %v528_v33 }
  0xfe   : > { %v521_v40 = vadd.f32 %v784_v13, %v520_v36  ;;  %v536_v41 = vadd.f32 %v535_v38, %v529_v37 }
 0x100   : > { %v522_v43 = vadd.f32 %v785_v17, %v521_v40  ;;  %v537_v44 = vadd.f32 %v536_v41, %v530_v39 }
 0x102   : > { %523 = vst [vmem:[%s262_s24] sm:$0xff] %v522_v43  ;;  %v538_v45 = vadd.f32 %v537_v44, %v531_v42 }
 0x104   : > { %539 = vst [vmem:[%s266_s27] sm:$0xff] %v538_v45 }
 0x105 PF: > { %s15_s17 = sadd.s32 1, %s860_s17   ;;  %s973_s15 = smov %s856_s16 }
 0x106   : > { %p12_p6 = scmp.ge.s32.totalorder %s15_s17, 4   ;;  %s974_s16 = smov %s976_s18 }
 0x108   :  { %14 = sbr.rel (!%p12_p6) target bundleno = 2 (0x2), region = 93 }

</bundles_post_ra>
